<compile_context>
chip_gen: v6e
topology: v6e:2x2x1
jax: 0.10.0
libtpu: 0.0.40
codegen_flags: <defaults>
</compile_context>

<pallas_src>
import jax
import jax.numpy as jnp
from jax.experimental import pallas as pl
from jax.experimental.pallas import tpu as pltpu


def _round_up(x, m):
    return ((x + m - 1) // m) * m


def _pad2d(a, rows, cols):
    pr, pc = rows - a.shape[0], cols - a.shape[1]
    if pr == 0 and pc == 0:
        return a
    return jnp.pad(a, ((0, pr), (0, pc)))


# ---------------- phase 1: Linear1 (bf16 MXU) + per-tile batch statistics ----
def _linear1_stats_kernel(x_ref, w1_ref, h_ref, sum_ref, sq_ref):
    # bf16 operands, f32 accumulation on the MXU.
    h = jnp.dot(x_ref[...], w1_ref[...], preferred_element_type=jnp.float32)
    # One-pass partial statistics for this batch tile, reduced from the f32
    # accumulator (NOT the bf16-rounded store). Padded rows of x are exact
    # zeros and there is no bias, so they contribute nothing.
    sum_ref[...] = jnp.sum(h, axis=0, keepdims=True)[None]
    sq_ref[...] = jnp.sum(h * h, axis=0, keepdims=True)[None]
    # Store h in bf16: halves the HBM writeback here and the HBM read in the
    # memory-bound phase 2.
    h_ref[...] = h.astype(jnp.bfloat16)


# ---------------- phase 2: folded BN + ReLU + Linear2 (bf16 MXU) -------------
def _bn_relu_linear2_kernel(h_ref, scale_ref, shift_ref, w2_ref, b2_ref, o_ref):
    # Upcast the bf16 h, apply the folded training-mode BatchNorm + affine as a
    # single f32 FMA, then ReLU (VPU).
    h = h_ref[...].astype(jnp.float32)
    hn = jnp.maximum(h * scale_ref[...] + shift_ref[...], 0.0)
    y = jnp.dot(hn.astype(jnp.bfloat16), w2_ref[...],
                preferred_element_type=jnp.float32) + b2_ref[...]
    o_ref[...] = y.astype(o_ref.dtype)


def prediction_mlp(x, w1, b1, gamma, beta, w2, b2, *, block_m=256, eps=1e-5):
    """SimSiam prediction-MLP forward (training-mode BatchNorm1d).

    x: (N, in_dim); w1: (in_dim, hidden); w2: (hidden, out_dim)
    b1/gamma/beta: (1, hidden); b2: (1, out_dim)

    b1 is accepted for interface parity with nn.Linear but unused: a
    per-feature bias before training-mode BatchNorm cancels exactly. This
    kernel is NOT valid for eval-mode BN with running statistics.

    block_m: max batch tile (multiple of 16). 256 suits all generations at
    SimSiam shapes; 512 is only worthwhile on v6e (128 MiB VMEM) with large N.
    bf16 MXU operands (f32 accumulate) and bf16 storage of the intermediate h
    are intentional perf tradeoffs; expect ~bf16-level accuracy, not f32-exact.
    """
    del b1  # cancels under training-mode BatchNorm
    n, in_dim = x.shape
    hidden = w1.shape[1]
    out_dim = w2.shape[1]
    out_dtype = x.dtype

    # Lane-dense padding: feature axes to multiples of 128. Zero-padded weight
    # rows/columns and gamma/beta/b2 pads make the extra lanes exact no-ops.
    in_p = _round_up(in_dim, 128)
    hid_p = _round_up(hidden, 128)
    out_p = _round_up(out_dim, 128)

    # Batch tiling (sublane axis): tiles are multiples of 16 (bf16-native
    # sublane packing). Cap the tile so n_tiles >= 2 whenever the batch allows
    # it: the "parallel" axis feeds v7x's two TensorCores and keeps the
    # double-buffered pipeline fed on every generation.
    n_r8 = _round_up(n, 8)
    tm = min(block_m, max(16, _round_up(n_r8 // 2, 16)))
    n_p = _round_up(n, tm)
    n_tiles = n_p // tm

    x_p = _pad2d(x, n_p, in_p).astype(jnp.bfloat16)
    w1_p = _pad2d(w1, in_p, hid_p).astype(jnp.bfloat16)
    w2_p = _pad2d(w2, hid_p, out_p).astype(jnp.bfloat16)
    gamma_p = _pad2d(gamma.astype(jnp.float32), 1, hid_p)
    beta_p = _pad2d(beta.astype(jnp.float32), 1, hid_p)
    b2_p = _pad2d(b2.astype(jnp.float32), 1, out_p)

    # Explicit VMEM budget: well under the v7x 32 MiB scoped default even at
    # 2048-wide SimSiam shapes with block_m=256; safe on v5e/v6e too.
    cparams = pltpu.CompilerParams(
        dimension_semantics=("parallel",),
        vmem_limit_bytes=32 * 1024 * 1024,
    )

    # ---- phase 1: h = x @ w1 (bf16 MXU) + partial sum / sumsq per N-tile ----
    h, psum, psq = pl.pallas_call(
        _linear1_stats_kernel,
        out_shape=(
            jax.ShapeDtypeStruct((n_p, hid_p), jnp.bfloat16),
            jax.ShapeDtypeStruct((n_tiles, 1, hid_p), jnp.float32),
            jax.ShapeDtypeStruct((n_tiles, 1, hid_p), jnp.float32),
        ),
        grid_spec=pltpu.PrefetchScalarGridSpec(
            num_scalar_prefetch=0,
            grid=(n_tiles,),
            in_specs=[
                pl.BlockSpec((tm, in_p), lambda i: (i, 0)),
                pl.BlockSpec((in_p, hid_p), lambda i: (0, 0)),
            ],
            out_specs=[
                pl.BlockSpec((tm, hid_p), lambda i: (i, 0)),
                pl.BlockSpec((1, 1, hid_p), lambda i: (i, 0, 0)),
                pl.BlockSpec((1, 1, hid_p), lambda i: (i, 0, 0)),
            ],
        ),
        compiler_params=cparams,
    )(x_p, w1_p)

    # Tiny (hidden-sized) fold of the partial stats into the BN scale/shift FMA.
    # Divide by the TRUE batch size (padded rows are exact zeros).
    inv_n = 1.0 / n
    mean = psum.sum(axis=0) * inv_n                                # (1, hid_p)
    var = jnp.maximum(psq.sum(axis=0) * inv_n - mean * mean, 0.0)  # biased var
    scale = gamma_p * jax.lax.rsqrt(var + eps)
    shift = beta_p - mean * scale

    # ---- phase 2: y = relu(h * scale + shift) @ w2 + b2 ----
    y = pl.pallas_call(
        _bn_relu_linear2_kernel,
        out_shape=jax.ShapeDtypeStruct((n_p, out_p), out_dtype),
        grid_spec=pltpu.PrefetchScalarGridSpec(
            num_scalar_prefetch=0,
            grid=(n_tiles,),
            in_specs=[
                pl.BlockSpec((tm, hid_p), lambda i: (i, 0)),
                pl.BlockSpec((1, hid_p), lambda i: (0, 0)),
                pl.BlockSpec((1, hid_p), lambda i: (0, 0)),
                pl.BlockSpec((hid_p, out_p), lambda i: (0, 0)),
                pl.BlockSpec((1, out_p), lambda i: (0, 0)),
            ],
            out_specs=pl.BlockSpec((tm, out_p), lambda i: (i, 0)),
        ),
        compiler_params=cparams,
    )(h, scale, shift, w2_p, b2_p)

    return y[:n, :out_dim]


def _reference(x, w1, b1, gamma, beta, w2, b2, eps=1e-5):
    # Pure f32 JAX reference matching the PyTorch module (training-mode BN).
    h = x.astype(jnp.float32) @ w1.astype(jnp.float32) + b1
    mean = jnp.mean(h, axis=0, keepdims=True)
    var = jnp.mean((h - mean) ** 2, axis=0, keepdims=True)   # biased variance
    h = (h - mean) * jax.lax.rsqrt(var + eps)
    h = h * gamma + beta
    h = jnp.maximum(h, 0.0)
    return h @ w2.astype(jnp.float32) + b2


if __name__ == "__main__":
    # Small shapes consistent with the module (in_dim=1000, hidden=512,
    # out_dim=1000 in the original; scaled down here). Chosen to exercise
    # feature padding (96->128, 80->128), batch-row padding (40->64), and the
    # multi-tile "parallel" grid path (n_tiles=2 with tm=32).
    N, IN_DIM, HIDDEN_DIM, OUT_DIM = 40, 96, 64, 80

    key = jax.random.PRNGKey(0)
    k_x, k_w1, k_b1, k_g, k_bt, k_w2, k_b2 = jax.random.split(key, 7)

    x = jax.random.normal(k_x, (N, IN_DIM), dtype=jnp.float32)

    # Deterministic parameter init (uniform, roughly PyTorch Linear scale).
    lim1 = 1.0 / (IN_DIM ** 0.5)
    w1 = jax.random.uniform(k_w1, (IN_DIM, HIDDEN_DIM), jnp.float32, -lim1, lim1)
    b1 = jax.random.uniform(k_b1, (1, HIDDEN_DIM), jnp.float32, -lim1, lim1)
    # Non-trivial BN affine params to exercise the folded FMA path.
    gamma = jax.random.uniform(k_g, (1, HIDDEN_DIM), jnp.float32, 0.5, 1.5)
    beta = jax.random.uniform(k_bt, (1, HIDDEN_DIM), jnp.float32, -0.5, 0.5)
    lim2 = 1.0 / (HIDDEN_DIM ** 0.5)
    w2 = jax.random.uniform(k_w2, (HIDDEN_DIM, OUT_DIM), jnp.float32, -lim2, lim2)
    b2 = jax.random.uniform(k_b2, (1, OUT_DIM), jnp.float32, -lim2, lim2)

    out = jax.jit(prediction_mlp)(x, w1, b1, gamma, beta, w2, b2)
    out = jax.block_until_ready(out)

    ref = jax.block_until_ready(_reference(x, w1, b1, gamma, beta, w2, b2))
    assert out.shape == (N, OUT_DIM)
    # bf16 MXU operands + bf16 h storage vs a pure-f32 reference -> loose tol.
    assert jnp.allclose(out, ref, atol=3e-2, rtol=3e-2), "mismatch vs JAX reference"

    print("KERNEL_OK")
</pallas_src>

<mosaic_0001>
module attributes {stable_mosaic.version = 11 : i64} {
  func.func @_linear1_stats_kernel(%arg0: i32, %arg1: memref<32x128xbf16, #tpu.memory_space<vmem>>, %arg2: memref<128x128xbf16, #tpu.memory_space<vmem>>, %arg3: memref<32x128xbf16, #tpu.memory_space<vmem>>, %arg4: memref<1x1x128xf32, #tpu.memory_space<vmem>>, %arg5: memref<1x1x128xf32, #tpu.memory_space<vmem>>) attributes {dimension_semantics = [#tpu.dimension_semantics<parallel>], iteration_bounds = array<i64: 2>, scalar_prefetch = 0 : i64, scratch_operands = 0 : i64, tpu.core_type = #tpu.core_type<tc>, window_params = [{transform_indices = @transform_0, window_bounds = array<i64: 32, 128>}, {pipeline_mode = #tpu.pipeline_mode<synchronous>, transform_indices = @transform_1, window_bounds = array<i64: 128, 128>}, {transform_indices = @transform_2, window_bounds = array<i64: 32, 128>}, {transform_indices = @transform_3, window_bounds = array<i64: 1, 1, 128>}, {transform_indices = @transform_4, window_bounds = array<i64: 1, 1, 128>}]} {
    %c0 = arith.constant 0 : index
    %c0_0 = arith.constant 0 : index
    %0 = vector.load %arg1[%c0, %c0_0] : memref<32x128xbf16, #tpu.memory_space<vmem>>, vector<32x128xbf16>
    %c0_1 = arith.constant 0 : index
    %c0_2 = arith.constant 0 : index
    %1 = vector.load %arg2[%c0_1, %c0_2] : memref<128x128xbf16, #tpu.memory_space<vmem>>, vector<128x128xbf16>
    %cst = arith.constant dense<0.000000e+00> : vector<32x128xf32>
    %2 = tpu.matmul %0, %1, %cst {dimension_numbers = #tpu.dot_dimension_numbers<[1], [0], [0], [1], [0, 0, 1, 1], [], []>} : vector<32x128xbf16>, vector<128x128xbf16>, vector<32x128xf32> -> vector<32x128xf32>
    %cst_3 = arith.constant dense<0.000000e+00> : vector<128xf32>
    %3 = vector.multi_reduction <add>, %2, %cst_3 [0] : vector<32x128xf32> to vector<128xf32>
    %4 = vector.shape_cast %3 : vector<128xf32> to vector<1x128xf32>
    %5 = vector.shape_cast %4 : vector<1x128xf32> to vector<1x1x128xf32>
    %c0_4 = arith.constant 0 : index
    %c0_5 = arith.constant 0 : index
    %c0_6 = arith.constant 0 : index
    %6 = vector.load %arg4[%c0_4, %c0_5, %c0_6] : memref<1x1x128xf32, #tpu.memory_space<vmem>>, vector<1x1x128xf32>
    tpu.vector_store %arg4[%c0_4, %c0_5, %c0_6], %5 {strides = array<i32>} : memref<1x1x128xf32, #tpu.memory_space<vmem>>, vector<1x1x128xf32>,
    %7 = arith.mulf %2, %2 : vector<32x128xf32>
    %cst_7 = arith.constant dense<0.000000e+00> : vector<128xf32>
    %8 = vector.multi_reduction <add>, %7, %cst_7 [0] : vector<32x128xf32> to vector<128xf32>
    %9 = vector.shape_cast %8 : vector<128xf32> to vector<1x128xf32>
    %10 = vector.shape_cast %9 : vector<1x128xf32> to vector<1x1x128xf32>
    %c0_8 = arith.constant 0 : index
    %c0_9 = arith.constant 0 : index
    %c0_10 = arith.constant 0 : index
    %11 = vector.load %arg5[%c0_8, %c0_9, %c0_10] : memref<1x1x128xf32, #tpu.memory_space<vmem>>, vector<1x1x128xf32>
    tpu.vector_store %arg5[%c0_8, %c0_9, %c0_10], %10 {strides = array<i32>} : memref<1x1x128xf32, #tpu.memory_space<vmem>>, vector<1x1x128xf32>,
    %12 = arith.truncf %2 : vector<32x128xf32> to vector<32x128xbf16>
    %c0_11 = arith.constant 0 : index
    %c0_12 = arith.constant 0 : index
    %13 = vector.load %arg3[%c0_11, %c0_12] : memref<32x128xbf16, #tpu.memory_space<vmem>>, vector<32x128xbf16>
    tpu.vector_store %arg3[%c0_11, %c0_12], %12 {strides = array<i32>} : memref<32x128xbf16, #tpu.memory_space<vmem>>, vector<32x128xbf16>,
    return
  }
  func.func @transform_0(%arg0: i32) -> (i32, i32) {
    %c0_i32 = arith.constant 0 : i32
    %c0_i32_0 = arith.constant 0 : i32
    return %arg0, %c0_i32 : i32, i32
  }
  func.func @transform_1(%arg0: i32) -> (i32, i32) {
    %c0_i32 = arith.constant 0 : i32
    %c0_i32_0 = arith.constant 0 : i32
    %c0_i32_1 = arith.constant 0 : i32
    return %c0_i32, %c0_i32_0 : i32, i32
  }
  func.func @transform_2(%arg0: i32) -> (i32, i32) {
    %c0_i32 = arith.constant 0 : i32
    %c0_i32_0 = arith.constant 0 : i32
    return %arg0, %c0_i32 : i32, i32
  }
  func.func @transform_3(%arg0: i32) -> (i32, i32, i32) {
    %c0_i32 = arith.constant 0 : i32
    %c0_i32_0 = arith.constant 0 : i32
    %c0_i32_1 = arith.constant 0 : i32
    return %arg0, %c0_i32, %c0_i32_0 : i32, i32, i32
  }
  func.func @transform_4(%arg0: i32) -> (i32, i32, i32) {
    %c0_i32 = arith.constant 0 : i32
    %c0_i32_0 = arith.constant 0 : i32
    %c0_i32_1 = arith.constant 0 : i32
    return %arg0, %c0_i32, %c0_i32_0 : i32, i32, i32
  }
}

module attributes {stable_mosaic.version = 11 : i64} {
  func.func @_bn_relu_linear2_kernel(%arg0: i32, %arg1: memref<32x128xbf16, #tpu.memory_space<vmem>>, %arg2: memref<1x128xf32, #tpu.memory_space<vmem>>, %arg3: memref<1x128xf32, #tpu.memory_space<vmem>>, %arg4: memref<128x128xbf16, #tpu.memory_space<vmem>>, %arg5: memref<1x128xf32, #tpu.memory_space<vmem>>, %arg6: memref<32x128xf32, #tpu.memory_space<vmem>>) attributes {dimension_semantics = [#tpu.dimension_semantics<parallel>], iteration_bounds = array<i64: 2>, scalar_prefetch = 0 : i64, scratch_operands = 0 : i64, tpu.core_type = #tpu.core_type<tc>, window_params = [{transform_indices = @transform_0, window_bounds = array<i64: 32, 128>}, {pipeline_mode = #tpu.pipeline_mode<synchronous>, transform_indices = @transform_1, window_bounds = array<i64: 1, 128>}, {pipeline_mode = #tpu.pipeline_mode<synchronous>, transform_indices = @transform_2, window_bounds = array<i64: 1, 128>}, {pipeline_mode = #tpu.pipeline_mode<synchronous>, transform_indices = @transform_3, window_bounds = array<i64: 128, 128>}, {pipeline_mode = #tpu.pipeline_mode<synchronous>, transform_indices = @transform_4, window_bounds = array<i64: 1, 128>}, {transform_indices = @transform_5, window_bounds = array<i64: 32, 128>}]} {
    %c0 = arith.constant 0 : index
    %c0_0 = arith.constant 0 : index
    %0 = vector.load %arg1[%c0, %c0_0] : memref<32x128xbf16, #tpu.memory_space<vmem>>, vector<32x128xbf16>
    %1 = arith.extf %0 : vector<32x128xbf16> to vector<32x128xf32>
    %c0_1 = arith.constant 0 : index
    %c0_2 = arith.constant 0 : index
    %2 = vector.load %arg2[%c0_1, %c0_2] : memref<1x128xf32, #tpu.memory_space<vmem>>, vector<1x128xf32>
    %3 = vector.broadcast %2 : vector<1x128xf32> to vector<32x128xf32>
    %4 = arith.mulf %1, %3 : vector<32x128xf32>
    %c0_3 = arith.constant 0 : index
    %c0_4 = arith.constant 0 : index
    %5 = vector.load %arg3[%c0_3, %c0_4] : memref<1x128xf32, #tpu.memory_space<vmem>>, vector<1x128xf32>
    %6 = vector.broadcast %5 : vector<1x128xf32> to vector<32x128xf32>
    %7 = arith.addf %4, %6 : vector<32x128xf32>
    %cst = arith.constant 0.000000e+00 : f32
    %8 = vector.broadcast %cst : f32 to vector<32x128xf32>
    %9 = arith.maximumf %7, %8 : vector<32x128xf32>
    %10 = arith.truncf %9 : vector<32x128xf32> to vector<32x128xbf16>
    %c0_5 = arith.constant 0 : index
    %c0_6 = arith.constant 0 : index
    %11 = vector.load %arg4[%c0_5, %c0_6] : memref<128x128xbf16, #tpu.memory_space<vmem>>, vector<128x128xbf16>
    %cst_7 = arith.constant dense<0.000000e+00> : vector<32x128xf32>
    %12 = tpu.matmul %10, %11, %cst_7 {dimension_numbers = #tpu.dot_dimension_numbers<[1], [0], [0], [1], [0, 0, 1, 1], [], []>} : vector<32x128xbf16>, vector<128x128xbf16>, vector<32x128xf32> -> vector<32x128xf32>
    %c0_8 = arith.constant 0 : index
    %c0_9 = arith.constant 0 : index
    %13 = vector.load %arg5[%c0_8, %c0_9] : memref<1x128xf32, #tpu.memory_space<vmem>>, vector<1x128xf32>
    %14 = vector.broadcast %13 : vector<1x128xf32> to vector<32x128xf32>
    %15 = arith.addf %12, %14 : vector<32x128xf32>
    %c0_10 = arith.constant 0 : index
    %c0_11 = arith.constant 0 : index
    %16 = vector.load %arg6[%c0_10, %c0_11] : memref<32x128xf32, #tpu.memory_space<vmem>>, vector<32x128xf32>
    tpu.vector_store %arg6[%c0_10, %c0_11], %15 {strides = array<i32>} : memref<32x128xf32, #tpu.memory_space<vmem>>, vector<32x128xf32>,
    return
  }
  func.func @transform_0(%arg0: i32) -> (i32, i32) {
    %c0_i32 = arith.constant 0 : i32
    %c0_i32_0 = arith.constant 0 : i32
    return %arg0, %c0_i32 : i32, i32
  }
  func.func @transform_1(%arg0: i32) -> (i32, i32) {
    %c0_i32 = arith.constant 0 : i32
    %c0_i32_0 = arith.constant 0 : i32
    %c0_i32_1 = arith.constant 0 : i32
    return %c0_i32, %c0_i32_0 : i32, i32
  }
  func.func @transform_2(%arg0: i32) -> (i32, i32) {
    %c0_i32 = arith.constant 0 : i32
    %c0_i32_0 = arith.constant 0 : i32
    %c0_i32_1 = arith.constant 0 : i32
    return %c0_i32, %c0_i32_0 : i32, i32
  }
  func.func @transform_3(%arg0: i32) -> (i32, i32) {
    %c0_i32 = arith.constant 0 : i32
    %c0_i32_0 = arith.constant 0 : i32
    %c0_i32_1 = arith.constant 0 : i32
    return %c0_i32, %c0_i32_0 : i32, i32
  }
  func.func @transform_4(%arg0: i32) -> (i32, i32) {
    %c0_i32 = arith.constant 0 : i32
    %c0_i32_0 = arith.constant 0 : i32
    %c0_i32_1 = arith.constant 0 : i32
    return %c0_i32, %c0_i32_0 : i32, i32
  }
  func.func @transform_5(%arg0: i32) -> (i32, i32) {
    %c0_i32 = arith.constant 0 : i32
    %c0_i32_0 = arith.constant 0 : i32
    return %arg0, %c0_i32 : i32, i32
  }
}

</mosaic_0001>

<bundles_post_ra>
// kernel: prediction_mlp.3
= control target key start
LH: loop header
LB: loop body
LE: loop exit
PB: predicated region body
PF: predicated region fallthrough
CT: control target
= control target key end

     0   :  { %s560_s18 = smov 0   ;;  %s614_s0 = inlined_call_operand.vmem [shape: bf16[64,128], index: 0, kind: input, shape index: {}]   ;;  %s615_s1 = inlined_call_operand.vmem [shape: f32[1,128], index: 1, kind: input, shape index: {}]   ;;  %s616_s2 = inlined_call_operand.vmem [shape: f32[1,128], index: 2, kind: input, shape index: {}]   ;;  %s617_s3 = inlined_call_operand.vmem [shape: bf16[128,128], index: 3, kind: input, shape index: {}]   ;;  %s618_s4 = inlined_call_operand.vmem [shape: f32[1,128], index: 4, kind: input, shape index: {}]   ;;  %s619_s5 = inlined_call_operand.vmem [shape: f32[64,128], index: 5, kind: output, shape index: {}]  }
   0x1 LB: > { %s445_s19 = sadd.s32 4294967295, %s528_s18   ;;  %p449_p0 = scmp.ge.s32.totalorder %s528_s18, 1  ;;  %s528_s18 = sphi %s560_s18, %s15_s18  }
   0x2   : > { %p188_p1 = scmp.lt.s32.totalorder %s528_s18, 3 }
   0x4   : > { %p189_p2 = pnand %p449_p0, %p188_p1 }
   0x5   : > { %s450_s22 = sshll.u32 (!%p189_p2), %s445_s19, 2 }
   0x6   : > { %192 = sbr.rel (%p189_p2) target bundleno = 246 (0xf6), region = 40  ;;  %p217_p3 = scmp.lt.s32.totalorder (!%p189_p2), %s450_s22, 7 }
   0xb   : > { %v514_v0 = vld [vmem:[%s617_s3 + $0x38] sm:$0xff]   ;;  %v515_v1 = vld [vmem:[%s617_s3 + $0x30] sm:$0xff]   ;;  %s621_s22 = smov (!%p217_p3, %s450_s22), 7  ;;  %v516_v2 = vld [vmem:[%s617_s3 + $0x28] sm:$0xff]  }
   0xc   : > { %486 = vmatprep.subr.bf16.mxu0 %v514_v0  ;;  %s451_s27 = sshll.u32 %s621_s22, 2  ;;  %v517_v3 = vld [vmem:[%s617_s3 + $0x20] sm:$0xff]   ;;  %v518_v12 = vld [vmem:[%s617_s3 + $0x18] sm:$0xff]   ;;  %v519_v19 = vld [vmem:[%s617_s3 + $0x10] sm:$0xff]   ;;  %s453_s21 = sshll.u32 %s621_s22, 3 }
   0xd   : > { %487 = vmatpush3.bf16.msra.mxu0 %v514_v0  ;;  %s220_s30 = scalar_lea.vmem %s614_s0, %s451_s27  ;;  %v454_v5 = vld [vmem:[%s615_s1] ss:$0 sm:$0xff]  ;;  %v520_v23 = vld [vmem:[%s617_s3 + $0x8] sm:$0xff]   ;;  %s226_s27 = scalar_lea.vmem %s619_s5, %s453_s21 }
   0xe   : > { %488 = vmatprep.subr.bf16.mxu0 %v515_v1  ;;  %v468_v4 = vld [vmem:[%s220_s30] sm:$0xff]   ;;  %v475_v9 = vld [vmem:[%s220_s30 + $0x8] sm:$0xff]  }
   0xf   : > { %v469_v6 = vunpack.c.l.bf16 %v468_v4  ;;  %v470_v7 = vunpack.c.h.bf16 %v468_v4  ;;  %v455_v8 = vld [vmem:[%s616_s2] ss:$0 sm:$0xff]  ;;  %v473_v15 = vunpack.c.l.bf16 %v475_v9  ;;  %v474_v16 = vunpack.c.h.bf16 %v475_v9 }
  0x10   : > { %v521_v26 = vld [vmem:[%s617_s3] sm:$0xff]  }
  0x11   : > { %489 = vmatpush3.bf16.msra.mxu0 %v515_v1  ;;  %v244_v10 = vmul.f32 %v469_v6, %v454_v5  ;;  %v245_v11 = vmul.f32 %v470_v7, %v454_v5  ;;  %v246_v21 = vmul.f32 %v473_v15, %v454_v5  ;;  %v247_v22 = vmul.f32 %v474_v16, %v454_v5  ;;  %v456_v31 = vld [vmem:[%s618_s4] ss:$0 sm:$0xff] }
  0x12   : > { %490 = vmatprep.subr.bf16.mxu0 %v516_v2 }
  0x13   : > { %v255_v13 = vadd.f32 %v455_v8, %v244_v10  ;;  %v256_v14 = vadd.f32 %v455_v8, %v245_v11  ;;  %v257_v24 = vadd.f32 %v455_v8, %v246_v21  ;;  %v258_v25 = vadd.f32 %v455_v8, %v247_v22 }
  0x15   : > { %491 = vmatpush3.bf16.msra.mxu0 %v516_v2  ;;  %v259_v17 = vmax.f32 %v255_v13, 0.0  ;;  %v260_v18 = vmax.f32 %v256_v14, 0.0  ;;  %v261_v27 = vmax.f32 %v257_v24, 0.0  ;;  %v262_v28 = vmax.f32 %v258_v25, 0.0 }
  0x16   : > { %492 = vmatprep.subr.bf16.mxu0 %v517_v3 }
  0x17   : > { %v263_v20 = vpack.c.bf16 %v260_v18, %v259_v17  ;;  %v264_v29 = vpack.c.bf16 %v262_v28, %v261_v27 }
  0x19   : > { %493 = vmatpush3.bf16.msra.mxu0 %v517_v3  ;;  %502 = vmatprep.mubr.bf16.mxu0 %v263_v20 }
  0x1a   : > { %494 = vmatprep.subr.bf16.mxu0 %v518_v12 }
  0x1d   : > { %495 = vmatpush3.bf16.msra.mxu0 %v518_v12 }
  0x1e   : > { %496 = vmatprep.subr.bf16.mxu0 %v519_v19 }
  0x21   : > { %497 = vmatpush3.bf16.msra.mxu0 %v519_v19 }
  0x22   : > { %498 = vmatprep.subr.bf16.mxu0 %v520_v23 }
  0x25   : > { %499 = vmatpush3.bf16.msra.mxu0 %v520_v23 }
  0x26   : > { %500 = vmatprep.subr.bf16.mxu0 %v521_v26 }
  0x29   : > { %501 = vmatpush3.bf16.msra.mxu0 %v521_v26 }
  0x2c   : > { %503 = vmatmul.mubr.bf16.vlgmr.msra.gmra.mxu0 %v264_v29 }
  0xec   : > { %v504_v30 = vpop.f32.mrf.mxu0 }
  0xed   : > { %v379_v37 = vadd.f32 %v504_v30, %v456_v31 }
  0xee   : > { %v370_v32 = vpop.f32.mrf.mxu0 }
  0xef   : > { %v371_v33 = vadd.f32 %v456_v31, %v370_v32  ;;  %387 = vst [vmem:[%s226_s27 + $0x10] sm:$0xff] %v379_v37 }
  0xf0   : > { %v505_v34 = vpop.f32.mrf.mxu0 }
  0xf1   : > { %385 = vst [vmem:[%s226_s27] sm:$0xff] %v371_v33  ;;  %v382_v38 = vadd.f32 %v505_v34, %v456_v31 }
  0xf2   : > { %v373_v35 = vpop.f32.mrf.mxu0 }
  0xf3   : > { %v374_v36 = vadd.f32 %v456_v31, %v373_v35  ;;  %388 = vst [vmem:[%s226_s27 + $0x18] sm:$0xff] %v382_v38 }
  0xf5   : > { %386 = vst [vmem:[%s226_s27 + $0x8] sm:$0xff] %v374_v36 }
  0xf6 PF: > { %s15_s18 = sadd.s32 1, %s528_s18  }
  0xf7   : > { %p12_p4 = scmp.ge.s32.totalorder %s15_s18, 4  }
  0xf9   :  { %14 = sbr.rel (!%p12_p4) target bundleno = 1 (0x1), region = 70 }

// kernel: prediction_mlp.2
= control target key start
LH: loop header
LB: loop body
LE: loop exit
PB: predicated region body
PF: predicated region fallthrough
CT: control target
= control target key end

     0   :  { %s619_s15 = smov 0   ;;  %s674_s0 = inlined_call_operand.vmem [shape: bf16[64,128], index: 0, kind: input, shape index: {}]   ;;  %s675_s1 = inlined_call_operand.vmem [shape: bf16[128,128], index: 1, kind: input, shape index: {}]   ;;  %s676_s2 = inlined_call_operand.vmem [shape: bf16[64,128], index: 2, kind: output, shape index: {0}]   ;;  %s677_s3 = inlined_call_operand.vmem [shape: f32[2,1,128], index: 3, kind: output, shape index: {1}]   ;;  %s678_s4 = inlined_call_operand.vmem [shape: f32[2,1,128], index: 4, kind: output, shape index: {2}]  }
   0x1 LB: > { %s625_s16 = sadd.s32 4294967295, %s592_s15   ;;  %p502_p0 = scmp.ge.s32.totalorder %s592_s15, 1  ;;  %s592_s15 = sphi %s619_s15, %s15_s15  }
   0x2   : > { %p168_p1 = scmp.lt.s32.totalorder %s592_s15, 3 }
   0x4   : > { %p169_p2 = pnand %p502_p0, %p168_p1 }
   0x5   : > { %s503_s19 = sshll.u32 (!%p169_p2), %s625_s16, 2  ;;  %p212_p4 = scmp.lt.s32.totalorder (!%p169_p2), %s625_s16, 1 }
   0x6   : > { %172 = sbr.rel (%p169_p2) target bundleno = 264 (0x108), region = 28  ;;  %p201_p3 = scmp.lt.s32.totalorder (!%p169_p2), %s503_s19, 7 }
   0xb   : > { %v576_v0 = vld [vmem:[%s675_s1 + $0x38] sm:$0xff]   ;;  %v577_v1 = vld [vmem:[%s675_s1 + $0x30] sm:$0xff]   ;;  %s680_s19 = smov (!%p201_p3, %s503_s19), 7  ;;  %v578_v2 = vld [vmem:[%s675_s1 + $0x28] sm:$0xff]   ;;  %s682_s16 = smov (!%p212_p4, %s625_s16), 1 }
   0xc   : > { %548 = vmatprep.subr.bf16.mxu0 %v576_v0  ;;  %s504_s24 = sshll.u32 %s680_s19, 2  ;;  %v579_v3 = vld [vmem:[%s675_s1 + $0x20] sm:$0xff]   ;;  %v580_v5 = vld [vmem:[%s675_s1 + $0x18] sm:$0xff]   ;;  %v581_v6 = vld [vmem:[%s675_s1 + $0x10] sm:$0xff]   ;;  %s214_s19 = scalar_lea.vmem %s677_s3, %s682_s16 }
   0xd   : > { %549 = vmatpush3.bf16.msra.mxu0 %v576_v0  ;;  %s204_s27 = scalar_lea.vmem %s674_s0, %s504_s24  ;;  %v582_v7 = vld [vmem:[%s675_s1 + $0x8] sm:$0xff]   ;;  %v583_v8 = vld [vmem:[%s675_s1] sm:$0xff]   ;;  %s210_s14 = scalar_lea.vmem %s676_s2, %s504_s24 }
   0xe   : > { %550 = vmatprep.subr.bf16.mxu0 %v577_v1  ;;  %v584_v4 = vld [vmem:[%s204_s27] sm:$0xff]   ;;  %v585_v9 = vld [vmem:[%s204_s27 + $0x8] sm:$0xff]   ;;  %s217_s22 = scalar_lea.vmem %s678_s4, %s682_s16 }
   0xf   : > { %564 = vmatprep.mubr.bf16.mxu0 %v584_v4 }
  0x11   : > { %551 = vmatpush3.bf16.msra.mxu0 %v577_v1 }
  0x12   : > { %552 = vmatprep.subr.bf16.mxu0 %v578_v2 }
  0x15   : > { %553 = vmatpush3.bf16.msra.mxu0 %v578_v2 }
  0x16   : > { %554 = vmatprep.subr.bf16.mxu0 %v579_v3 }
  0x19   : > { %555 = vmatpush3.bf16.msra.mxu0 %v579_v3 }
  0x1a   : > { %556 = vmatprep.subr.bf16.mxu0 %v580_v5 }
  0x1d   : > { %557 = vmatpush3.bf16.msra.mxu0 %v580_v5 }
  0x1e   : > { %558 = vmatprep.subr.bf16.mxu0 %v581_v6 }
  0x21   : > { %559 = vmatpush3.bf16.msra.mxu0 %v581_v6 }
  0x22   : > { %560 = vmatprep.subr.bf16.mxu0 %v582_v7 }
  0x25   : > { %561 = vmatpush3.bf16.msra.mxu0 %v582_v7 }
  0x26   : > { %562 = vmatprep.subr.bf16.mxu0 %v583_v8 }
  0x29   : > { %563 = vmatpush3.bf16.msra.mxu0 %v583_v8 }
  0x2c   : > { %565 = vmatmul.mubr.bf16.vlgmr.msra.gmra.mxu0 %v585_v9 }
  0xec   : > { %v566_v10 = vpop.f32.mrf.mxu0 }
  0xed   : > { %v360_v19 = vmul.f32 %v566_v10, %v566_v10 }
  0xee   : > { %v333_v11 = vpop.f32.mrf.mxu0 }
  0xef   : > { %v358_v14 = vmul.f32 %v333_v11, %v333_v11 }
  0xf0   : > { %v567_v12 = vpop.f32.mrf.mxu0 }
  0xf1   : > { %v535_v18 = vpack.c.bf16 %v567_v12, %v566_v10  ;;  %v361_v22 = vmul.f32 %v567_v12, %v567_v12 }
  0xf2   : > { %v336_v13 = vpop.f32.mrf.mxu0 }
  0xf3   : > { %v348_v15 = vadd.f32 %v336_v13, %v333_v11  ;;  %v359_v16 = vmul.f32 %v336_v13, %v336_v13  ;;  %v530_v17 = vpack.c.bf16 %v336_v13, %v333_v11  ;;  %537 = vst [vmem:[%s210_s14 + $0x8] sm:$0xff] %v535_v18  }
  0xf5   : > { %v349_v20 = vadd.f32 %v566_v10, %v348_v15  ;;  %v362_v21 = vadd.f32 %v359_v16, %v358_v14  ;;  %531 = vst [vmem:[%s210_s14] sm:$0xff] %v530_v17  }
  0xf7   : > { %v350_v23 = vadd.f32 %v567_v12, %v349_v20  ;;  %v363_v24 = vadd.f32 %v362_v21, %v360_v19 }
  0xf9   : > { %v351_v25 = vrot.slane %v350_v23, 4  ;;  %v364_v26 = vadd.f32 %v363_v24, %v361_v22 }
  0xfb   : > { %v352_v27 = vadd.f32 %v351_v25, %v350_v23  ;;  %v365_v28 = vrot.slane %v364_v26, 4 }
  0xfd   : > { %v353_v29 = vrot.slane %v352_v27, 2  ;;  %v366_v30 = vadd.f32 %v365_v28, %v364_v26 }
  0xff   : > { %v354_v31 = vadd.f32 %v353_v29, %v352_v27  ;;  %v367_v32 = vrot.slane %v366_v30, 2 }
 0x101   : > { %v355_v33 = vrot.slane %v354_v31, 1  ;;  %v368_v34 = vadd.f32 %v367_v32, %v366_v30 }
 0x103   : > { %v356_v35 = vadd.f32 %v355_v33, %v354_v31  ;;  %v369_v36 = vrot.slane %v368_v34, 1 }
 0x105   : > { %357 = vst [vmem:[%s214_s19] sm:$0x1] %v356_v35  ;;  %v370_v37 = vadd.f32 %v369_v36, %v368_v34 }
 0x107   : > { %371 = vst [vmem:[%s217_s22] sm:$0x1] %v370_v37 }
 0x108 PF: > { %s15_s15 = sadd.s32 1, %s592_s15  }
 0x109   : > { %p12_p5 = scmp.ge.s32.totalorder %s15_s15, 4  }
 0x10b   :  { %14 = sbr.rel (!%p12_p5) target bundleno = 1 (0x1), region = 82 }

</bundles_post_ra>
